<compile_context>
chip_gen: v5e
topology: v5e:2x2
jax: 0.10.0
libtpu: 0.0.40
codegen_flags: <defaults>
</compile_context>

<pallas_src>
import functools

import jax
import jax.numpy as jnp
import numpy as np
from jax.experimental import pallas as pl
from jax.experimental.pallas import tpu as pltpu


# -----------------------------------------------------------------------------
# Pallas kernel: recurrent part of one LSTM layer.
# grid = (batch_blocks, seq_chunks); h/c state carried in VMEM scratch.
# -----------------------------------------------------------------------------
def _lstm_layer_kernel(gx_ref, whh_ref, out_ref, h_sc, c_sc):
    # First chunk of a (new) batch block: reset carried state (h0 = c0 = 0).
    @pl.when(pl.program_id(1) == 0)
    def _():
        h_sc[...] = jnp.zeros_like(h_sc)
        c_sc[...] = jnp.zeros_like(c_sc)

    H = h_sc.shape[-1]
    T = gx_ref.shape[0]
    whh = whh_ref[...]                      # (H, 4H), resident across the chunk

    h = h_sc[...]                           # (batch_block, H)
    c = c_sc[...]                           # (batch_block, H)

    # Fully-unrolled loop over the chunk's timesteps (static trip count).
    for t in range(T):
        # gates_x already contains x_t @ W_ih^T + (b_ih + b_hh); only the serial
        # h_{t-1} @ W_hh^T matmul remains on the critical path.
        gates = gx_ref[t] + jnp.dot(h, whh, preferred_element_type=jnp.float32)
        i_g = jax.nn.sigmoid(gates[:, 0 * H:1 * H])
        f_g = jax.nn.sigmoid(gates[:, 1 * H:2 * H])
        g_g = jnp.tanh(gates[:, 2 * H:3 * H])
        o_g = jax.nn.sigmoid(gates[:, 3 * H:4 * H])
        c = f_g * c + i_g * g_g
        h = o_g * jnp.tanh(c)
        out_ref[t] = h.astype(out_ref.dtype)

    h_sc[...] = h
    c_sc[...] = c


def lstm_layer_pallas(x_sbf, w_ih_t, w_hh_t, b, *, chunk_t, batch_block=None):
    """One LSTM layer.

    x_sbf:   (seq_p, batch_p, in_dim) f32, seq_p % chunk_t == 0, batch_p % 8 == 0
    w_ih_t:  (in_dim, 4H)   (pre-transposed W_ih)
    w_hh_t:  (H, 4H)        (pre-transposed W_hh)
    b:       (1, 4H)        (b_ih + b_hh)
    Returns  (seq_p, batch_p, H) f32.
    """
    seq_p, batch_p, in_dim = x_sbf.shape
    H = w_hh_t.shape[0]
    G = 4 * H
    assert w_ih_t.shape == (in_dim, G) and b.shape == (1, G)
    assert seq_p % chunk_t == 0 and batch_p % 8 == 0

    if batch_block is None:
        batch_block = batch_p               # single batch block by default
    assert batch_p % batch_block == 0 and batch_block % 8 == 0

    # --- Hoisted, time-independent input projection: one big MXU matmul, with
    #     the (combined) bias folded into it.
    gates_x = (
        jnp.dot(x_sbf.reshape(seq_p * batch_p, in_dim), w_ih_t,
                preferred_element_type=jnp.float32)
        + b
    ).reshape(seq_p, batch_p, G)

    num_bb = batch_p // batch_block
    num_tc = seq_p // chunk_t

    # Advisory cost estimate for XLA's scheduler (recurrent matmul + gate math).
    flops = 2 * seq_p * batch_p * H * G + 10 * seq_p * batch_p * H
    transcendentals = 5 * seq_p * batch_p * H
    bytes_accessed = 4 * (gates_x.size + seq_p * batch_p * H + w_hh_t.size)

    return pl.pallas_call(
        _lstm_layer_kernel,
        out_shape=jax.ShapeDtypeStruct((seq_p, batch_p, H), jnp.float32),
        grid_spec=pltpu.PrefetchScalarGridSpec(
            num_scalar_prefetch=0,
            grid=(num_bb, num_tc),
            in_specs=[
                pl.BlockSpec((chunk_t, batch_block, G), lambda bb, tc: (tc, bb, 0)),
                pl.BlockSpec((H, G), lambda bb, tc: (0, 0)),
            ],
            out_specs=pl.BlockSpec((chunk_t, batch_block, H),
                                   lambda bb, tc: (tc, bb, 0)),
            scratch_shapes=[
                pltpu.VMEM((batch_block, H), jnp.float32),  # h_t carry
                pltpu.VMEM((batch_block, H), jnp.float32),  # c_t carry
            ],
        ),
        compiler_params=pltpu.CompilerParams(
            # batch blocks are independent (megacore-shardable on v7x);
            # the time axis is a serial recurrence.
            dimension_semantics=("parallel", "arbitrary"),
        ),
        cost_estimate=pl.CostEstimate(
            flops=flops,
            transcendentals=transcendentals,
            bytes_accessed=bytes_accessed,
        ),
    )(gates_x, w_hh_t)


# -----------------------------------------------------------------------------
# Encoder: multi-layer LSTM, batch_first, returns full output sequence.
# -----------------------------------------------------------------------------
def encoder_forward(x_bsf, params, *, chunk_t=4, batch_block=None):
    """x_bsf: (batch, seq, input_size).  Returns (batch, seq, hidden_size)."""
    batch, seq, _ = x_bsf.shape
    h = jnp.transpose(x_bsf, (1, 0, 2)).astype(jnp.float32)   # (seq, batch, feat)

    # Pad batch to a multiple of 8 sublanes and seq to a multiple of chunk_t;
    # padded rows/timesteps are independent and sliced off at the end.
    pad_s = (-seq) % chunk_t
    pad_b = (-batch) % 8
    if pad_s or pad_b:
        h = jnp.pad(h, ((0, pad_s), (0, pad_b), (0, 0)))

    for (w_ih_t, w_hh_t, b) in params:
        h = lstm_layer_pallas(h, w_ih_t, w_hh_t, b,
                              chunk_t=chunk_t, batch_block=batch_block)

    h = h[:seq, :batch, :]
    return jnp.transpose(h, (1, 0, 2))                         # (batch, seq, hidden)


def init_lstm_params(key, input_size, hidden_size, num_layers):
    """Deterministic init matching nn.LSTM parameter shapes (U(-k, k), k=1/sqrt(H)).
    Stored pre-transposed: W_ih^T (in_dim, 4H), W_hh^T (H, 4H), combined bias (1, 4H)."""
    k = 1.0 / np.sqrt(hidden_size)
    params = []
    for layer in range(num_layers):
        in_dim = input_size if layer == 0 else hidden_size
        key, k1, k2, k3, k4 = jax.random.split(key, 5)
        w_ih = jax.random.uniform(k1, (4 * hidden_size, in_dim), jnp.float32, -k, k)
        w_hh = jax.random.uniform(k2, (4 * hidden_size, hidden_size), jnp.float32, -k, k)
        b_ih = jax.random.uniform(k3, (4 * hidden_size,), jnp.float32, -k, k)
        b_hh = jax.random.uniform(k4, (4 * hidden_size,), jnp.float32, -k, k)
        params.append((w_ih.T, w_hh.T, (b_ih + b_hh)[None, :]))
    return params


# -----------------------------------------------------------------------------
# Pure-JAX reference (for correctness check)
# -----------------------------------------------------------------------------
def encoder_reference(x_bsf, params):
    h = jnp.transpose(x_bsf, (1, 0, 2)).astype(jnp.float32)
    for (w_ih_t, w_hh_t, b) in params:
        H = w_hh_t.shape[0]
        batch = h.shape[1]

        def step(carry, x_t):
            hp, cp = carry
            g = x_t @ w_ih_t + hp @ w_hh_t + b
            i = jax.nn.sigmoid(g[:, :H])
            f = jax.nn.sigmoid(g[:, H:2 * H])
            gg = jnp.tanh(g[:, 2 * H:3 * H])
            o = jax.nn.sigmoid(g[:, 3 * H:])
            cn = f * cp + i * gg
            hn = o * jnp.tanh(cn)
            return (hn, cn), hn

        init = (jnp.zeros((batch, H), jnp.float32), jnp.zeros((batch, H), jnp.float32))
        _, h = jax.lax.scan(step, init, h)
    return jnp.transpose(h, (1, 0, 2))


if __name__ == "__main__":
    # Small shapes consistent with the Encoder module
    batch, seq_len = 2, 8
    input_size, hidden_size, num_layers = 16, 32, 2

    key = jax.random.PRNGKey(0)
    key_x, key_p = jax.random.split(key)
    x = jax.random.normal(key_x, (batch, seq_len, input_size), jnp.float32)
    params = init_lstm_params(key_p, input_size, hidden_size, num_layers)

    fwd = jax.jit(functools.partial(encoder_forward, chunk_t=4))
    out = jax.block_until_ready(fwd(x, params))
    assert out.shape == (batch, seq_len, hidden_size)

    ref = jax.block_until_ready(encoder_reference(x, params))
    np.testing.assert_allclose(np.asarray(out), np.asarray(ref), rtol=2e-4, atol=1e-5)

    print("KERNEL_OK")
</pallas_src>

<mosaic_0001>
module attributes {stable_mosaic.version = 11 : i64} {
  func.func @_lstm_layer_kernel(%arg0: i32, %arg1: i32, %arg2: memref<4x8x128xf32, #tpu.memory_space<vmem>>, %arg3: memref<32x128xf32, #tpu.memory_space<vmem>>, %arg4: memref<4x8x32xf32, #tpu.memory_space<vmem>>, %arg5: memref<8x32xf32, #tpu.memory_space<vmem>>, %arg6: memref<8x32xf32, #tpu.memory_space<vmem>>) attributes {dimension_semantics = [#tpu.dimension_semantics<parallel>, #tpu.dimension_semantics<arbitrary>], iteration_bounds = array<i64: 1, 2>, scalar_prefetch = 0 : i64, scratch_operands = 2 : i64, tpu.core_type = #tpu.core_type<tc>, window_params = [{transform_indices = @transform_0, window_bounds = array<i64: 4, 8, 128>}, {pipeline_mode = #tpu.pipeline_mode<synchronous>, transform_indices = @transform_1, window_bounds = array<i64: 32, 128>}, {transform_indices = @transform_2, window_bounds = array<i64: 4, 8, 32>}]} {
    %c0_i32 = arith.constant 0 : i32
    %0 = arith.cmpi eq, %arg1, %c0_i32 : i32
    %1 = arith.extui %0 : i1 to i32
    %c0_i32_0 = arith.constant 0 : i32
    %2 = arith.cmpi ne, %1, %c0_i32_0 : i32
    scf.if %2 {
      %cst_46 = arith.constant 0.000000e+00 : f32
      %136 = vector.broadcast %cst_46 : f32 to vector<8x32xf32>
      %c0_47 = arith.constant 0 : index
      %c0_48 = arith.constant 0 : index
      %137 = vector.load %arg5[%c0_47, %c0_48] : memref<8x32xf32, #tpu.memory_space<vmem>>, vector<8x32xf32>
      tpu.vector_store %arg5[%c0_47, %c0_48], %136 {strides = array<i32>} : memref<8x32xf32, #tpu.memory_space<vmem>>, vector<8x32xf32>,
      %cst_49 = arith.constant 0.000000e+00 : f32
      %138 = vector.broadcast %cst_49 : f32 to vector<8x32xf32>
      %c0_50 = arith.constant 0 : index
      %c0_51 = arith.constant 0 : index
      %139 = vector.load %arg6[%c0_50, %c0_51] : memref<8x32xf32, #tpu.memory_space<vmem>>, vector<8x32xf32>
      tpu.vector_store %arg6[%c0_50, %c0_51], %138 {strides = array<i32>} : memref<8x32xf32, #tpu.memory_space<vmem>>, vector<8x32xf32>,
    } else {
    }
    %c0 = arith.constant 0 : index
    %c0_1 = arith.constant 0 : index
    %3 = vector.load %arg3[%c0, %c0_1] : memref<32x128xf32, #tpu.memory_space<vmem>>, vector<32x128xf32>
    %c0_2 = arith.constant 0 : index
    %c0_3 = arith.constant 0 : index
    %4 = vector.load %arg5[%c0_2, %c0_3] : memref<8x32xf32, #tpu.memory_space<vmem>>, vector<8x32xf32>
    %c0_4 = arith.constant 0 : index
    %c0_5 = arith.constant 0 : index
    %5 = vector.load %arg6[%c0_4, %c0_5] : memref<8x32xf32, #tpu.memory_space<vmem>>, vector<8x32xf32>
    %c0_6 = arith.constant 0 : index
    %c0_7 = arith.constant 0 : index
    %c0_8 = arith.constant 0 : index
    %6 = vector.load %arg2[%c0_6, %c0_7, %c0_8] : memref<4x8x128xf32, #tpu.memory_space<vmem>>, vector<1x8x128xf32>
    %7 = vector.shape_cast %6 : vector<1x8x128xf32> to vector<8x128xf32>
    %cst = arith.constant dense<0.000000e+00> : vector<8x128xf32>
    %8 = tpu.matmul %4, %3, %cst {dimension_numbers = #tpu.dot_dimension_numbers<[1], [0], [0], [1], [0, 0, 1, 1], [], []>} : vector<8x32xf32>, vector<32x128xf32>, vector<8x128xf32> -> vector<8x128xf32>
    %9 = arith.addf %7, %8 : vector<8x128xf32>
    %10 = vector.extract_strided_slice %9 {offsets = [0, 0], sizes = [8, 32], strides = [1, 1]} : vector<8x128xf32> to vector<8x32xf32>
    %11 = arith.negf %10 : vector<8x32xf32>
    %12 = math.exp %11 : vector<8x32xf32>
    %cst_9 = arith.constant 1.000000e+00 : f32
    %13 = vector.broadcast %cst_9 : f32 to vector<8x32xf32>
    %14 = arith.addf %13, %12 : vector<8x32xf32>
    %15 = arith.divf %13, %14 : vector<8x32xf32>
    %16 = vector.extract_strided_slice %9 {offsets = [0, 32], sizes = [8, 32], strides = [1, 1]} : vector<8x128xf32> to vector<8x32xf32>
    %17 = arith.negf %16 : vector<8x32xf32>
    %18 = math.exp %17 : vector<8x32xf32>
    %cst_10 = arith.constant 1.000000e+00 : f32
    %19 = vector.broadcast %cst_10 : f32 to vector<8x32xf32>
    %20 = arith.addf %19, %18 : vector<8x32xf32>
    %21 = arith.divf %19, %20 : vector<8x32xf32>
    %22 = vector.extract_strided_slice %9 {offsets = [0, 64], sizes = [8, 32], strides = [1, 1]} : vector<8x128xf32> to vector<8x32xf32>
    %23 = math.tanh %22 : vector<8x32xf32>
    %24 = vector.extract_strided_slice %9 {offsets = [0, 96], sizes = [8, 32], strides = [1, 1]} : vector<8x128xf32> to vector<8x32xf32>
    %25 = arith.negf %24 : vector<8x32xf32>
    %26 = math.exp %25 : vector<8x32xf32>
    %cst_11 = arith.constant 1.000000e+00 : f32
    %27 = vector.broadcast %cst_11 : f32 to vector<8x32xf32>
    %28 = arith.addf %27, %26 : vector<8x32xf32>
    %29 = arith.divf %27, %28 : vector<8x32xf32>
    %30 = arith.mulf %21, %5 : vector<8x32xf32>
    %31 = arith.mulf %15, %23 : vector<8x32xf32>
    %32 = arith.addf %30, %31 : vector<8x32xf32>
    %33 = math.tanh %32 : vector<8x32xf32>
    %34 = arith.mulf %29, %33 : vector<8x32xf32>
    %c0_12 = arith.constant 0 : index
    %c0_13 = arith.constant 0 : index
    %c0_14 = arith.constant 0 : index
    %35 = vector.load %arg4[%c0_12, %c0_13, %c0_14] : memref<4x8x32xf32, #tpu.memory_space<vmem>>, vector<1x8x32xf32>
    %36 = vector.shape_cast %35 : vector<1x8x32xf32> to vector<8x32xf32>
    %37 = vector.shape_cast %34 : vector<8x32xf32> to vector<1x8x32xf32>
    tpu.vector_store %arg4[%c0_12, %c0_13, %c0_14], %37 {strides = array<i32>} : memref<4x8x32xf32, #tpu.memory_space<vmem>>, vector<1x8x32xf32>,
    %c1 = arith.constant 1 : index
    %c0_15 = arith.constant 0 : index
    %c0_16 = arith.constant 0 : index
    %38 = vector.load %arg2[%c1, %c0_15, %c0_16] : memref<4x8x128xf32, #tpu.memory_space<vmem>>, vector<1x8x128xf32>
    %39 = vector.shape_cast %38 : vector<1x8x128xf32> to vector<8x128xf32>
    %cst_17 = arith.constant dense<0.000000e+00> : vector<8x128xf32>
    %40 = tpu.matmul %34, %3, %cst_17 {dimension_numbers = #tpu.dot_dimension_numbers<[1], [0], [0], [1], [0, 0, 1, 1], [], []>} : vector<8x32xf32>, vector<32x128xf32>, vector<8x128xf32> -> vector<8x128xf32>
    %41 = arith.addf %39, %40 : vector<8x128xf32>
    %42 = vector.extract_strided_slice %41 {offsets = [0, 0], sizes = [8, 32], strides = [1, 1]} : vector<8x128xf32> to vector<8x32xf32>
    %43 = arith.negf %42 : vector<8x32xf32>
    %44 = math.exp %43 : vector<8x32xf32>
    %cst_18 = arith.constant 1.000000e+00 : f32
    %45 = vector.broadcast %cst_18 : f32 to vector<8x32xf32>
    %46 = arith.addf %45, %44 : vector<8x32xf32>
    %47 = arith.divf %45, %46 : vector<8x32xf32>
    %48 = vector.extract_strided_slice %41 {offsets = [0, 32], sizes = [8, 32], strides = [1, 1]} : vector<8x128xf32> to vector<8x32xf32>
    %49 = arith.negf %48 : vector<8x32xf32>
    %50 = math.exp %49 : vector<8x32xf32>
    %cst_19 = arith.constant 1.000000e+00 : f32
    %51 = vector.broadcast %cst_19 : f32 to vector<8x32xf32>
    %52 = arith.addf %51, %50 : vector<8x32xf32>
    %53 = arith.divf %51, %52 : vector<8x32xf32>
    %54 = vector.extract_strided_slice %41 {offsets = [0, 64], sizes = [8, 32], strides = [1, 1]} : vector<8x128xf32> to vector<8x32xf32>
    %55 = math.tanh %54 : vector<8x32xf32>
    %56 = vector.extract_strided_slice %41 {offsets = [0, 96], sizes = [8, 32], strides = [1, 1]} : vector<8x128xf32> to vector<8x32xf32>
    %57 = arith.negf %56 : vector<8x32xf32>
    %58 = math.exp %57 : vector<8x32xf32>
    %cst_20 = arith.constant 1.000000e+00 : f32
    %59 = vector.broadcast %cst_20 : f32 to vector<8x32xf32>
    %60 = arith.addf %59, %58 : vector<8x32xf32>
    %61 = arith.divf %59, %60 : vector<8x32xf32>
    %62 = arith.mulf %53, %32 : vector<8x32xf32>
    %63 = arith.mulf %47, %55 : vector<8x32xf32>
    %64 = arith.addf %62, %63 : vector<8x32xf32>
    %65 = math.tanh %64 : vector<8x32xf32>
    %66 = arith.mulf %61, %65 : vector<8x32xf32>
    %c1_21 = arith.constant 1 : index
    %c0_22 = arith.constant 0 : index
    %c0_23 = arith.constant 0 : index
    %67 = vector.load %arg4[%c1_21, %c0_22, %c0_23] : memref<4x8x32xf32, #tpu.memory_space<vmem>>, vector<1x8x32xf32>
    %68 = vector.shape_cast %67 : vector<1x8x32xf32> to vector<8x32xf32>
    %69 = vector.shape_cast %66 : vector<8x32xf32> to vector<1x8x32xf32>
    tpu.vector_store %arg4[%c1_21, %c0_22, %c0_23], %69 {strides = array<i32>} : memref<4x8x32xf32, #tpu.memory_space<vmem>>, vector<1x8x32xf32>,
    %c2 = arith.constant 2 : index
    %c0_24 = arith.constant 0 : index
    %c0_25 = arith.constant 0 : index
    %70 = vector.load %arg2[%c2, %c0_24, %c0_25] : memref<4x8x128xf32, #tpu.memory_space<vmem>>, vector<1x8x128xf32>
    %71 = vector.shape_cast %70 : vector<1x8x128xf32> to vector<8x128xf32>
    %cst_26 = arith.constant dense<0.000000e+00> : vector<8x128xf32>
    %72 = tpu.matmul %66, %3, %cst_26 {dimension_numbers = #tpu.dot_dimension_numbers<[1], [0], [0], [1], [0, 0, 1, 1], [], []>} : vector<8x32xf32>, vector<32x128xf32>, vector<8x128xf32> -> vector<8x128xf32>
    %73 = arith.addf %71, %72 : vector<8x128xf32>
    %74 = vector.extract_strided_slice %73 {offsets = [0, 0], sizes = [8, 32], strides = [1, 1]} : vector<8x128xf32> to vector<8x32xf32>
    %75 = arith.negf %74 : vector<8x32xf32>
    %76 = math.exp %75 : vector<8x32xf32>
    %cst_27 = arith.constant 1.000000e+00 : f32
    %77 = vector.broadcast %cst_27 : f32 to vector<8x32xf32>
    %78 = arith.addf %77, %76 : vector<8x32xf32>
    %79 = arith.divf %77, %78 : vector<8x32xf32>
    %80 = vector.extract_strided_slice %73 {offsets = [0, 32], sizes = [8, 32], strides = [1, 1]} : vector<8x128xf32> to vector<8x32xf32>
    %81 = arith.negf %80 : vector<8x32xf32>
    %82 = math.exp %81 : vector<8x32xf32>
    %cst_28 = arith.constant 1.000000e+00 : f32
    %83 = vector.broadcast %cst_28 : f32 to vector<8x32xf32>
    %84 = arith.addf %83, %82 : vector<8x32xf32>
    %85 = arith.divf %83, %84 : vector<8x32xf32>
    %86 = vector.extract_strided_slice %73 {offsets = [0, 64], sizes = [8, 32], strides = [1, 1]} : vector<8x128xf32> to vector<8x32xf32>
    %87 = math.tanh %86 : vector<8x32xf32>
    %88 = vector.extract_strided_slice %73 {offsets = [0, 96], sizes = [8, 32], strides = [1, 1]} : vector<8x128xf32> to vector<8x32xf32>
    %89 = arith.negf %88 : vector<8x32xf32>
    %90 = math.exp %89 : vector<8x32xf32>
    %cst_29 = arith.constant 1.000000e+00 : f32
    %91 = vector.broadcast %cst_29 : f32 to vector<8x32xf32>
    %92 = arith.addf %91, %90 : vector<8x32xf32>
    %93 = arith.divf %91, %92 : vector<8x32xf32>
    %94 = arith.mulf %85, %64 : vector<8x32xf32>
    %95 = arith.mulf %79, %87 : vector<8x32xf32>
    %96 = arith.addf %94, %95 : vector<8x32xf32>
    %97 = math.tanh %96 : vector<8x32xf32>
    %98 = arith.mulf %93, %97 : vector<8x32xf32>
    %c2_30 = arith.constant 2 : index
    %c0_31 = arith.constant 0 : index
    %c0_32 = arith.constant 0 : index
    %99 = vector.load %arg4[%c2_30, %c0_31, %c0_32] : memref<4x8x32xf32, #tpu.memory_space<vmem>>, vector<1x8x32xf32>
    %100 = vector.shape_cast %99 : vector<1x8x32xf32> to vector<8x32xf32>
    %101 = vector.shape_cast %98 : vector<8x32xf32> to vector<1x8x32xf32>
    tpu.vector_store %arg4[%c2_30, %c0_31, %c0_32], %101 {strides = array<i32>} : memref<4x8x32xf32, #tpu.memory_space<vmem>>, vector<1x8x32xf32>,
    %c3 = arith.constant 3 : index
    %c0_33 = arith.constant 0 : index
    %c0_34 = arith.constant 0 : index
    %102 = vector.load %arg2[%c3, %c0_33, %c0_34] : memref<4x8x128xf32, #tpu.memory_space<vmem>>, vector<1x8x128xf32>
    %103 = vector.shape_cast %102 : vector<1x8x128xf32> to vector<8x128xf32>
    %cst_35 = arith.constant dense<0.000000e+00> : vector<8x128xf32>
    %104 = tpu.matmul %98, %3, %cst_35 {dimension_numbers = #tpu.dot_dimension_numbers<[1], [0], [0], [1], [0, 0, 1, 1], [], []>} : vector<8x32xf32>, vector<32x128xf32>, vector<8x128xf32> -> vector<8x128xf32>
    %105 = arith.addf %103, %104 : vector<8x128xf32>
    %106 = vector.extract_strided_slice %105 {offsets = [0, 0], sizes = [8, 32], strides = [1, 1]} : vector<8x128xf32> to vector<8x32xf32>
    %107 = arith.negf %106 : vector<8x32xf32>
    %108 = math.exp %107 : vector<8x32xf32>
    %cst_36 = arith.constant 1.000000e+00 : f32
    %109 = vector.broadcast %cst_36 : f32 to vector<8x32xf32>
    %110 = arith.addf %109, %108 : vector<8x32xf32>
    %111 = arith.divf %109, %110 : vector<8x32xf32>
    %112 = vector.extract_strided_slice %105 {offsets = [0, 32], sizes = [8, 32], strides = [1, 1]} : vector<8x128xf32> to vector<8x32xf32>
    %113 = arith.negf %112 : vector<8x32xf32>
    %114 = math.exp %113 : vector<8x32xf32>
    %cst_37 = arith.constant 1.000000e+00 : f32
    %115 = vector.broadcast %cst_37 : f32 to vector<8x32xf32>
    %116 = arith.addf %115, %114 : vector<8x32xf32>
    %117 = arith.divf %115, %116 : vector<8x32xf32>
    %118 = vector.extract_strided_slice %105 {offsets = [0, 64], sizes = [8, 32], strides = [1, 1]} : vector<8x128xf32> to vector<8x32xf32>
    %119 = math.tanh %118 : vector<8x32xf32>
    %120 = vector.extract_strided_slice %105 {offsets = [0, 96], sizes = [8, 32], strides = [1, 1]} : vector<8x128xf32> to vector<8x32xf32>
    %121 = arith.negf %120 : vector<8x32xf32>
    %122 = math.exp %121 : vector<8x32xf32>
    %cst_38 = arith.constant 1.000000e+00 : f32
    %123 = vector.broadcast %cst_38 : f32 to vector<8x32xf32>
    %124 = arith.addf %123, %122 : vector<8x32xf32>
    %125 = arith.divf %123, %124 : vector<8x32xf32>
    %126 = arith.mulf %117, %96 : vector<8x32xf32>
    %127 = arith.mulf %111, %119 : vector<8x32xf32>
    %128 = arith.addf %126, %127 : vector<8x32xf32>
    %129 = math.tanh %128 : vector<8x32xf32>
    %130 = arith.mulf %125, %129 : vector<8x32xf32>
    %c3_39 = arith.constant 3 : index
    %c0_40 = arith.constant 0 : index
    %c0_41 = arith.constant 0 : index
    %131 = vector.load %arg4[%c3_39, %c0_40, %c0_41] : memref<4x8x32xf32, #tpu.memory_space<vmem>>, vector<1x8x32xf32>
    %132 = vector.shape_cast %131 : vector<1x8x32xf32> to vector<8x32xf32>
    %133 = vector.shape_cast %130 : vector<8x32xf32> to vector<1x8x32xf32>
    tpu.vector_store %arg4[%c3_39, %c0_40, %c0_41], %133 {strides = array<i32>} : memref<4x8x32xf32, #tpu.memory_space<vmem>>, vector<1x8x32xf32>,
    %c0_42 = arith.constant 0 : index
    %c0_43 = arith.constant 0 : index
    %134 = vector.load %arg5[%c0_42, %c0_43] : memref<8x32xf32, #tpu.memory_space<vmem>>, vector<8x32xf32>
    tpu.vector_store %arg5[%c0_42, %c0_43], %130 {strides = array<i32>} : memref<8x32xf32, #tpu.memory_space<vmem>>, vector<8x32xf32>,
    %c0_44 = arith.constant 0 : index
    %c0_45 = arith.constant 0 : index
    %135 = vector.load %arg6[%c0_44, %c0_45] : memref<8x32xf32, #tpu.memory_space<vmem>>, vector<8x32xf32>
    tpu.vector_store %arg6[%c0_44, %c0_45], %128 {strides = array<i32>} : memref<8x32xf32, #tpu.memory_space<vmem>>, vector<8x32xf32>,
    return
  }
  func.func @transform_0(%arg0: i32, %arg1: i32) -> (i32, i32, i32) {
    %c0_i32 = arith.constant 0 : i32
    %c0_i32_0 = arith.constant 0 : i32
    return %arg1, %arg0, %c0_i32 : i32, i32, i32
  }
  func.func @transform_1(%arg0: i32, %arg1: i32) -> (i32, i32) {
    %c0_i32 = arith.constant 0 : i32
    %c0_i32_0 = arith.constant 0 : i32
    %c0_i32_1 = arith.constant 0 : i32
    return %c0_i32, %c0_i32_0 : i32, i32
  }
  func.func @transform_2(%arg0: i32, %arg1: i32) -> (i32, i32, i32) {
    %c0_i32 = arith.constant 0 : i32
    %c0_i32_0 = arith.constant 0 : i32
    return %arg1, %arg0, %c0_i32 : i32, i32, i32
  }
}

</mosaic_0001>

<bundles_post_ra>
// kernel: encoder_forward.2
= control target key start
LH: loop header
LB: loop body
LE: loop exit
PB: predicated region body
PF: predicated region fallthrough
CT: control target
= control target key end

     0   :  { %s680_s9 = smov 0   ;;  %s682_s10 = smov 0   ;;  %s764_s0 = inlined_call_operand.vmem [shape: f32[8,8,128], index: 0, kind: input, shape index: {}]   ;;  %s765_s1 = inlined_call_operand.vmem [shape: f32[32,128], index: 1, kind: input, shape index: {}]   ;;  %s766_s2 = inlined_call_operand.vmem [shape: f32[8,8,32], index: 2, kind: output, shape index: {}]  }
   0x1   :  { %s684_s11 = smov 0  }
   0x2 LB: > { %s21_s12 = sadd.s32 1, %s655_s10  ;;  %p555_p0 = scmp.ge.s32.totalorder %s659_s11, 1  ;;  %s659_s11 = sphi %s684_s11, %s12_s11   ;;  %s655_s10 = sphi %s682_s10, %s768_s10   ;;  %s651_s9 = sphi %s680_s9, %s767_s9  }
   0x3   : > { %p22_p1 = scmp.ge.s32.totalorder %s21_s12, 2  ;;  %p132_p2 = scmp.lt.s32.totalorder %s659_s11, 3 }
   0x5   : > { %s770_s12 = smov (%p22_p1, %s21_s12), 0  ;;  %p133_p3 = pnand %p555_p0, %p132_p2 }
   0x6   : > { %s556_s13 = sshll.u32 (!%p133_p3), %s651_s9, 2  ;;  %p560_p5 = scmp.ne.s32.totalorder (!%p133_p3), %s651_s9, 0 }
   0x7   : > { %136 = sbr.rel (%p133_p3) target bundleno = 2354 (0x932), region = 28  ;;  %p161_p4 = scmp.lt.s32.totalorder (!%p133_p3), %s556_s13, 7 }
   0xc   : > { %s772_s13 = smov (!%p161_p4, %s556_s13), 7  ;;  %181 = sbr.rel (%p560_p5) target bundleno = 20 (0x14), region = 32 }
   0xd   : > { %s557_s14 = sshll.u32 %s772_s13, 3 }
   0xe   : > { %s701_s17 = scalar_lea.vmem %s764_s0, %s557_s14  ;;  %s706_s20 = scalar_lea.vmem %s766_s2, %s557_s14 }
  0x11   : > { %vm182_vm0 = vcmask 261120   ;;  %v661_v0 = vmov 0.0  }
  0x12   : > { %183 = vst.msk [vmem:[#allocation2] sm:$0xff] %vm182_vm0, %v661_v0 }
  0x13   : > { %184 = vst.msk [vmem:[#allocation3] sm:$0xff] %vm182_vm0, %v661_v0 }
  0x14 PF: > { %v188_v1 = vld [vmem:[%s765_s1 + $0x18] sm:$0xff]  ;;  %v187_v2 = vld [vmem:[%s765_s1 + $0x10] sm:$0xff]  ;;  %v186_v3 = vld [vmem:[%s765_s1 + $0x8] sm:$0xff]  ;;  %vm192_vm1 = vcmask 261120   ;;  %s662_s29 = smov 64   ;;  %s663_s30 = smov 32  }
  0x15   : > { %208 = vmatpush.msra.mxu0 %v188_v1  ;;  %279 = vmatpush.msra.mxu1 %v188_v1  ;;  %v185_v4 = vld [vmem:[%s765_s1] sm:$0xff]  ;;  %v563_v34 = vld [vmem:[%s701_s17 + $0x8] sm:$0xff]  ;;  %v567_v60 = vld [vmem:[%s701_s17 + $0x10] sm:$0xff]  ;;  %s664_s3 = smov 96  }
  0x16   : > { %347 = vmatpush.msra.mxu2 %v188_v1  ;;  %415 = vmatpush.msra.mxu3 %v188_v1  ;;  %v191_v6 = vld [vmem:[%s701_s17] sm:$0xff] }
  0x17   : > { %209 = vmatpush.msra.mxu0 %v187_v2  ;;  %280 = vmatpush.msra.mxu1 %v187_v2 }
  0x18   : > { %348 = vmatpush.msra.mxu2 %v187_v2  ;;  %416 = vmatpush.msra.mxu3 %v187_v2 }
  0x19   : > { %210 = vmatpush.msra.mxu0 %v186_v3  ;;  %v189_v5 = vld [vmem:[#allocation2] sm:$0xff]  ;;  %281 = vmatpush.msra.mxu1 %v186_v3 }
  0x1a   : > { %349 = vmatpush.msra.mxu2 %v186_v3  ;;  %417 = vmatpush.msra.mxu3 %v186_v3  ;;  %v190_v10 = vld [vmem:[#allocation3] sm:$0xff] }
  0x1b   : > { %211 = vmatpush.msra.mxu0 %v185_v4  ;;  %282 = vmatpush.msra.mxu1 %v185_v4 }
  0x1c   : > { %561 = vmatmul.msk.f32.vlgmr.msra.gmra.mxu0 %vm192_vm1, %v189_v5  ;;  %350 = vmatpush.msra.mxu2 %v185_v4 }
  0x1d   : > { %418 = vmatpush.msra.mxu3 %v185_v4 }
  0x99   : > { %v213_v7 = vpop.f32.mrf.mxu0 }
  0x9a   : > { %v216_v8 = vadd.f32 %v213_v7, %v191_v6 }
  0x9c   : > { %605 = vtanh.f32 %v216_v8  ;;  %v562_v11 = vmul.f32 -1.442695, %v216_v8 }
  0x9e   : > { %607 = vpow2.f32 %v562_v11 }
  0xa2   : > { %v606_v9 = vpop.eup %605 }
  0xa3   : > { %243 = vrot.lane.b32.xlu0 %v606_v9, %s662_s29 }
  0xa4   : > { %v608_v12 = vpop.eup %607 }
  0xa5   : > { %v220_v13 = vadd.f32 1.0, %v608_v12 }
  0xa7   : > { %609 = vrcp.f32 %v220_v13  ;;  %v232_v19 = vand.u32 2147483648, %v220_v13  ;;  %vm226_vm3 = vweird.f32 %v220_v13  ;;  %v230_v20 = vand.u32 2147483647, %v220_v13 }
  0xa9   : > { %v233_v22 = vor.u32 1.1754944e-38, %v232_v19  ;;  %vm231_vm5 = vcmp.eq.f32.partialorder %v230_v20, 8.507059e+37 }
  0xab   : > { %238 = vrot.lane.b32.xlu0 %v190_v10, %s663_s30 }
  0xad   : > { %v610_v14 = vpop.eup %609 }
  0xae   : > { %v222_v15 = vmul.f32 %v610_v14, %v220_v13  ;;  %vm227_vm2 = vweird.f32 %v610_v14 }
  0xaf   : > { %vm228_vm4 = vmor %vm226_vm3, %vm227_vm2 }
  0xb0   : > { %v223_v16 = vsub.f32 1.0, %v222_v15 }
  0xb2   : > { %v224_v17 = vmul.f32 %v610_v14, %v223_v16 }
  0xb4   : > { %v225_v18 = vadd.f32 %v610_v14, %v224_v17 }
  0xb6   : > { %v229_v21 = vsel %vm228_vm4, %v610_v14, %v225_v18 }
  0xb7   : > { %v234_v24 = vsel %vm231_vm5, %v233_v22, %v229_v21  ;;  %v571_v22 = vld [vmem:[%s701_s17 + $0x18] sm:$0xff] }
 0x115   : > { %v244_v23 = vpop.permute.xlu0 %243 }
 0x116   : > { %v246_v25 = vmul.f32 %v244_v23, %v234_v24 }
 0x118   : > { %248 = vrot.lane.b32.xlu1 %v246_v25, %s663_s30 }
 0x11d   : > { %v239_v26 = vpop.permute.xlu0 %238 }
 0x11e   : > { %v241_v27 = vmul.f32 %v239_v26, %v234_v24 }
 0x18a   : > { %v249_v28 = vpop.permute.xlu1 %248 }
 0x18b   : > { %v251_v29 = vadd.f32 %v249_v28, %v241_v27 }
 0x18d   : > { %611 = vtanh.f32 %v251_v29 }
 0x193   : > { %v612_v30 = vpop.eup %611 }
 0x194   : > { %254 = vrot.lane.b32.xlu1 %v612_v30, %s662_s29 }
 0x206   : > { %v255_v31 = vpop.permute.xlu1 %254 }
 0x207   : > { %v257_v32 = vmul.f32 %v255_v31, %v234_v24 }
 0x209   : > { %259 = vrot.lane.b32.xlu2 %v257_v32, %s663_s30 }
 0x263   : > { %v260_v33 = vpop.permute.xlu2 %259 }
 0x264   : > { %262 = vst.msk [vmem:[%s706_s20] sm:$0xff] %vm192_vm1, %v260_v33  ;;  %564 = vmatmul.msk.f32.vlgmr.msra.gmra.mxu1 %vm192_vm1, %v260_v33 }
 0x2e1   : > { %v284_v35 = vpop.f32.mrf.mxu1 }
 0x2e2   : > { %v287_v36 = vadd.f32 %v563_v34, %v284_v35 }
 0x2e4   : > { %613 = vtanh.f32 %v287_v36  ;;  %v565_v38 = vmul.f32 -1.442695, %v287_v36 }
 0x2e6   : > { %615 = vpow2.f32 %v565_v38 }
 0x2ea   : > { %v614_v37 = vpop.eup %613 }
 0x2eb   : > { %310 = vrot.lane.b32.xlu2 %v614_v37, %s662_s29 }
 0x2ec   : > { %v616_v39 = vpop.eup %615 }
 0x2ed   : > { %v291_v40 = vadd.f32 1.0, %v616_v39 }
 0x2ef   : > { %617 = vrcp.f32 %v291_v40  ;;  %v303_v46 = vand.u32 2147483648, %v291_v40  ;;  %vm297_vm7 = vweird.f32 %v291_v40  ;;  %v301_v47 = vand.u32 2147483647, %v291_v40 }
 0x2f1   : > { %v304_v49 = vor.u32 1.1754944e-38, %v303_v46  ;;  %vm302_vm9 = vcmp.eq.f32.partialorder %v301_v47, 8.507059e+37 }
 0x2f5   : > { %v618_v41 = vpop.eup %617 }
 0x2f6   : > { %v293_v42 = vmul.f32 %v618_v41, %v291_v40  ;;  %vm298_vm6 = vweird.f32 %v618_v41 }
 0x2f7   : > { %vm299_vm8 = vmor %vm297_vm7, %vm298_vm6 }
 0x2f8   : > { %v294_v43 = vsub.f32 1.0, %v293_v42 }
 0x2fa   : > { %v295_v44 = vmul.f32 %v618_v41, %v294_v43 }
 0x2fc   : > { %v296_v45 = vadd.f32 %v618_v41, %v295_v44 }
 0x2fe   : > { %v300_v48 = vsel %vm299_vm8, %v618_v41, %v296_v45 }
 0x2ff   : > { %v305_v51 = vsel %vm302_vm9, %v304_v49, %v300_v48 }
 0x300   : > { %v308_v53 = vmul.f32 %v305_v51, %v251_v29 }
 0x345   : > { %v311_v50 = vpop.permute.xlu2 %310 }
 0x346   : > { %v313_v52 = vmul.f32 %v311_v50, %v305_v51 }
 0x348   : > { %315 = vrot.lane.b32.xlu0 %v313_v52, %s663_s30 }
 0x3ba   : > { %v316_v54 = vpop.permute.xlu0 %315 }
 0x3bb   : > { %v318_v55 = vadd.f32 %v316_v54, %v308_v53 }
 0x3bd   : > { %619 = vtanh.f32 %v318_v55 }
 0x3c3   : > { %v620_v56 = vpop.eup %619 }
 0x3c4   : > { %321 = vrot.lane.b32.xlu1 %v620_v56, %s662_s29 }
 0x436   : > { %v322_v57 = vpop.permute.xlu1 %321 }
 0x437   : > { %v324_v58 = vmul.f32 %v322_v57, %v305_v51 }
 0x439   : > { %326 = vrot.lane.b32.xlu2 %v324_v58, %s663_s30 }
 0x493   : > { %v327_v59 = vpop.permute.xlu2 %326 }
 0x494   : > { %566 = vst.msk [vmem:[%s706_s20 + $0x8] sm:$0xff] %vm192_vm1, %v327_v59  ;;  %568 = vmatmul.msk.f32.vlgmr.msra.gmra.mxu2 %vm192_vm1, %v327_v59 }
 0x517   : > { %v352_v61 = vpop.f32.mrf.mxu2 }
 0x518   : > { %v355_v62 = vadd.f32 %v567_v60, %v352_v61 }
 0x51a   : > { %621 = vtanh.f32 %v355_v62  ;;  %v569_v0 = vmul.f32 -1.442695, %v355_v62 }
 0x51c   : > { %623 = vpow2.f32 %v569_v0 }
 0x520   : > { %v622_v63 = vpop.eup %621 }
 0x521   : > { %378 = vrot.lane.b32.xlu0 %v622_v63, %s662_s29 }
 0x522   : > { %v624_v1 = vpop.eup %623 }
 0x523   : > { %v359_v2 = vadd.f32 1.0, %v624_v1 }
 0x525   : > { %625 = vrcp.f32 %v359_v2  ;;  %v371_v8 = vand.u32 2147483648, %v359_v2  ;;  %vm365_vm11 = vweird.f32 %v359_v2  ;;  %v369_v9 = vand.u32 2147483647, %v359_v2 }
 0x527   : > { %v372_v11 = vor.u32 1.1754944e-38, %v371_v8  ;;  %vm370_vm13 = vcmp.eq.f32.partialorder %v369_v9, 8.507059e+37 }
 0x52b   : > { %v626_v3 = vpop.eup %625 }
 0x52c   : > { %v361_v4 = vmul.f32 %v626_v3, %v359_v2  ;;  %vm366_vm10 = vweird.f32 %v626_v3 }
 0x52d   : > { %vm367_vm12 = vmor %vm365_vm11, %vm366_vm10 }
 0x52e   : > { %v362_v5 = vsub.f32 1.0, %v361_v4 }
 0x530   : > { %v363_v6 = vmul.f32 %v626_v3, %v362_v5 }
 0x532   : > { %v364_v7 = vadd.f32 %v626_v3, %v363_v6 }
 0x534   : > { %v368_v10 = vsel %vm367_vm12, %v626_v3, %v364_v7 }
 0x535   : > { %v373_v13 = vsel %vm370_vm13, %v372_v11, %v368_v10 }
 0x536   : > { %v376_v15 = vmul.f32 %v373_v13, %v318_v55 }
 0x593   : > { %v379_v12 = vpop.permute.xlu0 %378 }
 0x594   : > { %v381_v14 = vmul.f32 %v379_v12, %v373_v13 }
 0x596   : > { %383 = vrot.lane.b32.xlu1 %v381_v14, %s663_s30 }
 0x608   : > { %v384_v16 = vpop.permute.xlu1 %383 }
 0x609   : > { %v386_v17 = vadd.f32 %v384_v16, %v376_v15 }
 0x60b   : > { %627 = vtanh.f32 %v386_v17 }
 0x611   : > { %v628_v18 = vpop.eup %627 }
 0x612   : > { %389 = vrot.lane.b32.xlu2 %v628_v18, %s662_s29 }
 0x66c   : > { %v390_v19 = vpop.permute.xlu2 %389 }
 0x66d   : > { %v392_v20 = vmul.f32 %v390_v19, %v373_v13 }
 0x66f   : > { %394 = vrot.lane.b32.xlu0 %v392_v20, %s663_s30 }
 0x6e1   : > { %v395_v21 = vpop.permute.xlu0 %394 }
 0x6e2   : > { %570 = vst.msk [vmem:[%s706_s20 + $0x10] sm:$0xff] %vm192_vm1, %v395_v21  ;;  %572 = vmatmul.msk.f32.vlgmr.msra.gmra.mxu3 %vm192_vm1, %v395_v21 }
 0x765   : > { %v420_v23 = vpop.f32.mrf.mxu3 }
 0x766   : > { %v423_v24 = vadd.f32 %v571_v22, %v420_v23 }
 0x768   : > { %629 = vtanh.f32 %v423_v24  ;;  %v573_v26 = vmul.f32 -1.442695, %v423_v24 }
 0x76a   : > { %631 = vpow2.f32 %v573_v26 }
 0x76e   : > { %v630_v25 = vpop.eup %629 }
 0x76f   : > { %446 = vrot.lane.b32.xlu1 %v630_v25, %s662_s29 }
 0x770   : > { %v632_v27 = vpop.eup %631 }
 0x771   : > { %v427_v28 = vadd.f32 1.0, %v632_v27 }
 0x773   : > { %633 = vrcp.f32 %v427_v28  ;;  %v439_v34 = vand.u32 2147483648, %v427_v28  ;;  %vm433_vm15 = vweird.f32 %v427_v28  ;;  %v437_v35 = vand.u32 2147483647, %v427_v28 }
 0x775   : > { %v440_v37 = vor.u32 1.1754944e-38, %v439_v34  ;;  %vm438_vm2 = vcmp.eq.f32.partialorder %v437_v35, 8.507059e+37 }
 0x779   : > { %v634_v29 = vpop.eup %633 }
 0x77a   : > { %v429_v30 = vmul.f32 %v634_v29, %v427_v28  ;;  %vm434_vm14 = vweird.f32 %v634_v29 }
 0x77b   : > { %vm435_vm0 = vmor %vm433_vm15, %vm434_vm14 }
 0x77c   : > { %v430_v31 = vsub.f32 1.0, %v429_v30 }
 0x77e   : > { %v431_v32 = vmul.f32 %v634_v29, %v430_v31 }
 0x780   : > { %v432_v33 = vadd.f32 %v634_v29, %v431_v32 }
 0x782   : > { %v436_v36 = vsel %vm435_vm0, %v634_v29, %v432_v33 }
 0x783   : > { %v441_v39 = vsel %vm438_vm2, %v440_v37, %v436_v36 }
 0x784   : > { %v444_v41 = vmul.f32 %v441_v39, %v386_v17 }
 0x7e1   : > { %v447_v38 = vpop.permute.xlu1 %446 }
 0x7e2   : > { %v449_v40 = vmul.f32 %v447_v38, %v441_v39 }
 0x7e4   : > { %451 = vrot.lane.b32.xlu2 %v449_v40, %s663_s30 }
 0x83e   : > { %v452_v42 = vpop.permute.xlu2 %451 }
 0x83f   : > { %v454_v43 = vadd.f32 %v452_v42, %v444_v41 }
 0x841   : > { %635 = vtanh.f32 %v454_v43  ;;  %469 = vrot.lane.b32.xlu2 %v454_v43, %s664_s3 }
 0x847   : > { %v636_v44 = vpop.eup %635 }
 0x848   : > { %457 = vrot.lane.b32.xlu0 %v636_v44, %s662_s29 }
 0x89b   : > { %v470_v45 = vpop.permute.xlu2 %469 }
 0x89c   : > { %472 = vst.msk [vmem:[#allocation3] sm:$0xff] %vm192_vm1, %v470_v45 }
 0x8ba   : > { %v458_v46 = vpop.permute.xlu0 %457 }
 0x8bb   : > { %v460_v47 = vmul.f32 %v458_v46, %v441_v39 }
 0x8bd   : > { %462 = vrot.lane.b32.xlu1 %v460_v47, %s663_s30 }
 0x92f   : > { %v463_v48 = vpop.permute.xlu1 %462 }
 0x930   : > { %574 = vst.msk [vmem:[%s706_s20 + $0x18] sm:$0xff] %vm192_vm1, %v463_v48 }
 0x931   : > { %467 = vst.msk [vmem:[#allocation2] sm:$0xff] %vm192_vm1, %v463_v48 }
 0x932 PF: > { %s12_s11 = sadd.s32 1, %s659_s11   ;;  %s767_s9 = smov %s655_s10 }
 0x933   : > { %p9_p6 = scmp.ge.s32.totalorder %s12_s11, 4   ;;  %s768_s10 = smov %s770_s12 }
 0x935   :  { %11 = sbr.rel (!%p9_p6) target bundleno = 2 (0x2), region = 68 }

</bundles_post_ra>
